<compile_context>
chip_gen: v7x
topology: tpu7x:2x2x1
jax: 0.10.0
libtpu: 0.0.40
codegen_flags: <defaults>
</compile_context>

<pallas_src>
import jax
import jax.numpy as jnp
from jax.experimental import pallas as pl
from jax.experimental.pallas import tpu as pltpu

_LANE = 128
_SUBLANE = 8


def _round_up(v, m):
    return ((v + m - 1) // m) * m


def _mlp_kernel(x_ref, w1_ref, b1_ref, w2_ref, b2_ref, o_ref):
    # fc1: (TB, IN_p) @ (IN_p, H_p) -> f32 accumulator
    h = jnp.dot(x_ref[...], w1_ref[...], preferred_element_type=jnp.float32)
    # bias + ReLU in f32 (keeps v5e's no-bf16 VPU happy and preserves accuracy)
    h = jnp.maximum(h + b1_ref[...], 0.0)
    # fc2: recast to bf16 for the MXU, accumulate f32
    y = jnp.dot(h.astype(w2_ref.dtype), w2_ref[...],
                preferred_element_type=jnp.float32)
    o_ref[...] = (y + b2_ref[...]).astype(o_ref.dtype)


def simple_fp4_model(x, w1, b1, w2, b2, *, block_b=128):
    """Fused relu(x @ w1 + b1) @ w2 + b2 with lane-dense padding & batch tiling."""
    B, IN = x.shape
    H = w1.shape[1]
    OUT = w2.shape[1]

    # --- Lane-dense padding of feature dims to multiples of 128 -------------
    IN_p = _round_up(IN, _LANE)
    H_p = _round_up(H, _LANE)
    OUT_p = _round_up(OUT, _LANE)

    # --- Batch tile: multiple of 8 sublanes, capped at block_b ---------------
    TB = min(block_b, _round_up(B, _SUBLANE))
    B_p = _round_up(B, TB)
    grid_b = B_p // TB

    # --- Prepare padded, bf16 MXU operands (zeros in padding are inert) ------
    x_p = jnp.pad(x, ((0, B_p - B), (0, IN_p - IN))).astype(jnp.bfloat16)
    w1_p = jnp.pad(w1, ((0, IN_p - IN), (0, H_p - H))).astype(jnp.bfloat16)
    w2_p = jnp.pad(w2, ((0, H_p - H), (0, OUT_p - OUT))).astype(jnp.bfloat16)
    # Biases stay f32, as (1, F) rows that broadcast over the batch tile.
    b1_p = jnp.pad(b1, (0, H_p - H)).reshape(1, H_p).astype(jnp.float32)
    b2_p = jnp.pad(b2, (0, OUT_p - OUT)).reshape(1, OUT_p).astype(jnp.float32)

    out_p = pl.pallas_call(
        _mlp_kernel,
        out_shape=jax.ShapeDtypeStruct((B_p, OUT_p), jnp.float32),
        grid=(grid_b,),
        in_specs=[
            pl.BlockSpec((TB, IN_p), lambda i: (i, 0)),     # x: streamed per tile
            pl.BlockSpec((IN_p, H_p), lambda i: (0, 0)),    # W1: VMEM-resident
            pl.BlockSpec((1, H_p), lambda i: (0, 0)),       # b1: VMEM-resident
            pl.BlockSpec((H_p, OUT_p), lambda i: (0, 0)),   # W2: VMEM-resident
            pl.BlockSpec((1, OUT_p), lambda i: (0, 0)),     # b2: VMEM-resident
        ],
        out_specs=pl.BlockSpec((TB, OUT_p), lambda i: (i, 0)),
        compiler_params=pltpu.CompilerParams(
            dimension_semantics=("parallel",),
        ),
    )(x_p, w1_p, b1_p, w2_p, b2_p)

    # Slice away batch / lane padding.
    return out_p[:B, :OUT].astype(x.dtype)


if __name__ == "__main__":
    # Small shapes consistent with the module's forward:
    #   x: (batch, in_features); fc1: in -> hidden; fc2: hidden -> out
    batch, in_features, hidden_features, out_features = 256, 32, 64, 32

    key = jax.random.PRNGKey(0)
    kx, kw1, kw2 = jax.random.split(key, 3)

    x = jax.random.normal(kx, (batch, in_features), dtype=jnp.float32)
    # Deterministic param init mirroring __init__: randn weights, zero biases.
    w1 = jax.random.normal(kw1, (in_features, hidden_features), dtype=jnp.float32)
    b1 = jnp.zeros((hidden_features,), dtype=jnp.float32)
    w2 = jax.random.normal(kw2, (hidden_features, out_features), dtype=jnp.float32)
    b2 = jnp.zeros((out_features,), dtype=jnp.float32)

    out = simple_fp4_model(x, w1, b1, w2, b2)
    out = jax.block_until_ready(out)
    assert out.shape == (batch, out_features)

    # Reference with matched bf16 operand quantization (f32 accumulation).
    xb = x.astype(jnp.bfloat16)
    w1b = w1.astype(jnp.bfloat16)
    w2b = w2.astype(jnp.bfloat16)
    h_ref = jnp.maximum(
        jnp.dot(xb, w1b, preferred_element_type=jnp.float32) + b1, 0.0)
    ref = jnp.dot(h_ref.astype(jnp.bfloat16), w2b,
                  preferred_element_type=jnp.float32) + b2
    assert jnp.allclose(out, ref, atol=1e-2, rtol=1e-2), "mismatch vs bf16 reference"

    # Loose sanity check against the pure-f32 math (bf16 rounding tolerance).
    ref_f32 = jnp.maximum(x @ w1 + b1, 0.0) @ w2 + b2
    assert jnp.allclose(out, ref_f32, atol=5e-1, rtol=5e-2), "mismatch vs f32 reference"

    print("KERNEL_OK")
</pallas_src>

<mosaic_0001>
module attributes {stable_mosaic.version = 11 : i64} {
  func.func @_mlp_kernel(%arg0: i32, %arg1: memref<128x128xbf16, #tpu.memory_space<vmem>>, %arg2: memref<128x128xbf16, #tpu.memory_space<vmem>>, %arg3: memref<1x128xf32, #tpu.memory_space<vmem>>, %arg4: memref<128x128xbf16, #tpu.memory_space<vmem>>, %arg5: memref<1x128xf32, #tpu.memory_space<vmem>>, %arg6: memref<128x128xf32, #tpu.memory_space<vmem>>) attributes {dimension_semantics = [#tpu.dimension_semantics<parallel>], iteration_bounds = array<i64: 2>, scalar_prefetch = 0 : i64, scratch_operands = 0 : i64, tpu.core_type = #tpu.core_type<tc>, window_params = [{transform_indices = @transform_0, window_bounds = array<i64: 128, 128>}, {pipeline_mode = #tpu.pipeline_mode<synchronous>, transform_indices = @transform_1, window_bounds = array<i64: 128, 128>}, {pipeline_mode = #tpu.pipeline_mode<synchronous>, transform_indices = @transform_2, window_bounds = array<i64: 1, 128>}, {pipeline_mode = #tpu.pipeline_mode<synchronous>, transform_indices = @transform_3, window_bounds = array<i64: 128, 128>}, {pipeline_mode = #tpu.pipeline_mode<synchronous>, transform_indices = @transform_4, window_bounds = array<i64: 1, 128>}, {transform_indices = @transform_5, window_bounds = array<i64: 128, 128>}]} {
    %c0 = arith.constant 0 : index
    %c0_0 = arith.constant 0 : index
    %0 = vector.load %arg1[%c0, %c0_0] : memref<128x128xbf16, #tpu.memory_space<vmem>>, vector<128x128xbf16>
    %c0_1 = arith.constant 0 : index
    %c0_2 = arith.constant 0 : index
    %1 = vector.load %arg2[%c0_1, %c0_2] : memref<128x128xbf16, #tpu.memory_space<vmem>>, vector<128x128xbf16>
    %cst = arith.constant dense<0.000000e+00> : vector<128x128xf32>
    %2 = tpu.matmul %0, %1, %cst {dimension_numbers = #tpu.dot_dimension_numbers<[1], [0], [0], [1], [0, 0, 1, 1], [], []>} : vector<128x128xbf16>, vector<128x128xbf16>, vector<128x128xf32> -> vector<128x128xf32>
    %c0_3 = arith.constant 0 : index
    %c0_4 = arith.constant 0 : index
    %3 = vector.load %arg3[%c0_3, %c0_4] : memref<1x128xf32, #tpu.memory_space<vmem>>, vector<1x128xf32>
    %4 = vector.broadcast %3 : vector<1x128xf32> to vector<128x128xf32>
    %5 = arith.addf %2, %4 : vector<128x128xf32>
    %cst_5 = arith.constant 0.000000e+00 : f32
    %6 = vector.broadcast %cst_5 : f32 to vector<128x128xf32>
    %7 = arith.maximumf %5, %6 : vector<128x128xf32>
    %8 = arith.truncf %7 : vector<128x128xf32> to vector<128x128xbf16>
    %c0_6 = arith.constant 0 : index
    %c0_7 = arith.constant 0 : index
    %9 = vector.load %arg4[%c0_6, %c0_7] : memref<128x128xbf16, #tpu.memory_space<vmem>>, vector<128x128xbf16>
    %cst_8 = arith.constant dense<0.000000e+00> : vector<128x128xf32>
    %10 = tpu.matmul %8, %9, %cst_8 {dimension_numbers = #tpu.dot_dimension_numbers<[1], [0], [0], [1], [0, 0, 1, 1], [], []>} : vector<128x128xbf16>, vector<128x128xbf16>, vector<128x128xf32> -> vector<128x128xf32>
    %c0_9 = arith.constant 0 : index
    %c0_10 = arith.constant 0 : index
    %11 = vector.load %arg5[%c0_9, %c0_10] : memref<1x128xf32, #tpu.memory_space<vmem>>, vector<1x128xf32>
    %12 = vector.broadcast %11 : vector<1x128xf32> to vector<128x128xf32>
    %13 = arith.addf %10, %12 : vector<128x128xf32>
    %c0_11 = arith.constant 0 : index
    %c0_12 = arith.constant 0 : index
    %14 = vector.load %arg6[%c0_11, %c0_12] : memref<128x128xf32, #tpu.memory_space<vmem>>, vector<128x128xf32>
    tpu.vector_store %arg6[%c0_11, %c0_12], %13 {strides = array<i32>} : memref<128x128xf32, #tpu.memory_space<vmem>>, vector<128x128xf32>,
    return
  }
  func.func @transform_0(%arg0: i32) -> (i32, i32) {
    %c0_i32 = arith.constant 0 : i32
    %c0_i32_0 = arith.constant 0 : i32
    return %arg0, %c0_i32 : i32, i32
  }
  func.func @transform_1(%arg0: i32) -> (i32, i32) {
    %c0_i32 = arith.constant 0 : i32
    %c0_i32_0 = arith.constant 0 : i32
    %c0_i32_1 = arith.constant 0 : i32
    return %c0_i32, %c0_i32_0 : i32, i32
  }
  func.func @transform_2(%arg0: i32) -> (i32, i32) {
    %c0_i32 = arith.constant 0 : i32
    %c0_i32_0 = arith.constant 0 : i32
    %c0_i32_1 = arith.constant 0 : i32
    return %c0_i32, %c0_i32_0 : i32, i32
  }
  func.func @transform_3(%arg0: i32) -> (i32, i32) {
    %c0_i32 = arith.constant 0 : i32
    %c0_i32_0 = arith.constant 0 : i32
    %c0_i32_1 = arith.constant 0 : i32
    return %c0_i32, %c0_i32_0 : i32, i32
  }
  func.func @transform_4(%arg0: i32) -> (i32, i32) {
    %c0_i32 = arith.constant 0 : i32
    %c0_i32_0 = arith.constant 0 : i32
    %c0_i32_1 = arith.constant 0 : i32
    return %c0_i32, %c0_i32_0 : i32, i32
  }
  func.func @transform_5(%arg0: i32) -> (i32, i32) {
    %c0_i32 = arith.constant 0 : i32
    %c0_i32_0 = arith.constant 0 : i32
    return %arg0, %c0_i32 : i32, i32
  }
}

</mosaic_0001>

<bundles_post_ra>
// kernel: tpu_custom_call.1
= control target key start
LH: loop header
LB: loop body
LE: loop exit
PB: predicated region body
PF: predicated region fallthrough
CT: control target
= control target key end

     0   :  { %10 = vsyncpa [#allocation3], 0  ;;  %s1533_s0 = inlined_call_operand.hbm [shape: bf16[256,128], index: 0, kind: input, shape index: {}]   ;;  %s1534_s1 = inlined_call_operand.hbm [shape: bf16[128,128], index: 1, kind: input, shape index: {}]   ;;  %s1535_s2 = inlined_call_operand.vmem [shape: f32[1,128], index: 2, kind: input, shape index: {}]   ;;  %s1536_s3 = inlined_call_operand.hbm [shape: bf16[128,128], index: 3, kind: input, shape index: {}]   ;;  %s1537_s4 = inlined_call_operand.vmem [shape: f32[1,128], index: 4, kind: input, shape index: {}]   ;;  %s1538_s5 = inlined_call_operand.hbm [shape: f32[256,128], index: 5, kind: output, shape index: {}]  }
   0x1   :  { %12 = vsyncpa [#allocation3 + $0x1], 0 }
   0x2   :  { %13 = vsyncpa [#allocation6], 0 }
   0x3   :  { %14 = vsyncpa [#allocation4], 0 }
   0x4   :  { %16 = vsyncpa [#allocation4 + $0x1], 0  ;;  %s1254_s18 = smov 0   ;;  %s1256_s19 = smov 0  }
   0x5   :  { %s1258_s20 = smov 0   ;;  %s1260_s21 = smov 0  }
   0x6 LB: > { %s1275_s22 = sadd.s32 4294967295, %s1214_s21   ;;  %s821_s23 = sadd.s32 4294967294, %s1214_s21   ;;  %s1214_s21 = sphi %s1260_s21, %s1558_s21   ;;  %s1210_s20 = sphi %s1258_s20, %s1557_s20   ;;  %s1206_s19 = sphi %s1256_s19, %s1556_s19   ;;  %s1202_s18 = sphi %s1254_s18, %s1555_s18  }
   0x7   : > { %p42_p0 = scmp.ne.s32.totalorder %s1206_s19, %s1202_s18  ;;  %p1539_p1 = scmp.eq.s32.totalorder %s1275_s22, 0 }
   0x8   : > { %p156_p3 = scmp.eq.s32.totalorder %s821_s23, 1  ;;  %p822_p5 = scmp.ge.s32.totalorder %s1214_s21, 1 }
   0x9   : > { %p1284_p4 = por %p1539_p1, %p42_p0  ;;  %p163_p7 = scmp.lt.s32.totalorder %s1214_s21, 3 }
   0xa   : > { %p1289_p6 = por %p156_p3, %p42_p0  ;;  %s1216_s27 = smov [#allocation5]  }
   0xb   : > { %s1542_s24 = scalar_select %p1284_p4, 1, 0 }
   0xc   : > { %s1543_s25 = scalar_select %p1289_p6, 1, 0 }
   0xd   : > { %p1294_p8 = pnand %p822_p5, %p163_p7  ;;  %s175_s28 = sshll.u32 %s1216_s27, 4  ;;  %s1298_s28 = int_to_ptr.vmem [resolvable:$true] %s175_s28 }
   0xe   : > { %s1217_s30 = smov [#allocation7]   ;;  %s1058_s9 = scalar_lea.hbm %s1534_s1, 1024 }
   0xf   : > { %p975_p9 = pneg %p1294_p8  ;;  %s191_s6 = sshll.u32 %s1217_s30, 4  ;;  %s1309_s6 = int_to_ptr.vmem [resolvable:$true] %s191_s6 }
  0x10   : > { %p1059_p12 = scmp.ne.s32.totalorder %s1534_s1, %s1058_s9  ;;  %p1065_p5 = scmp.lt.u32.totalorder %s1058_s9, %s1534_s1 }
  0x11   : > { %p1305_p11 = pnand %p975_p9, %p1539_p1 }
  0x13   : > { %p1060_p13 = pneg %p1305_p11 }
  0x15   : > { %p1061_p0 = pnand %p1060_p13, %p1059_p12 }
  0x17   : > { %p1062_p3 = pneg %p1061_p0 }
  0x19   : > { %p1067_p7 = pnand %p1065_p5, %p1062_p3 }
  0x1b   : > { %1070 = shalt.err (!%p1067_p7)
}
  0x1c   : > { %s1071_s14 = scalar_lea.vmem %s1298_s28, 1024  ;;  %p1079_p2 = scmp.lt.s32.totalorder %s1298_s28, %s1298_s28 }
  0x1d   : > { %p1072_p9 = scmp.ne.s32.totalorder %s1298_s28, %s1071_s14  ;;  %p1080_p12 = scmp.lt.s32.totalorder %s1071_s14, %s1071_s14 }
  0x1f   : > { %p1074_p10 = pnand %p1072_p9, %p1060_p13  ;;  %p1081_p0 = por %p1080_p12, %p1079_p2 }
  0x21   : > { %p1075_p1 = pneg %p1074_p10 }
  0x23   : > { %p1082_p6 = pnand %p1081_p0, %p1075_p1 }
  0x25   : > { %1085 = shalt.err (!%p1082_p6)
}
  0x26   : > { %s1218_s15 = smov 64   ;;  %s1219_s16 = smov 4  }
  0x27   : > { %978 = dma.hbm_to_vmem [thread:$0]  (!%p1305_p11), %s1534_s1, 1024, %s1298_s28, [#allocation6], %s1218_s15, %s1218_s15, %s1219_s16  }
  0x28   : > { %s1086_s7 = scalar_lea.hbm %s1536_s3, 1024 }
  0x29   : > { %p1087_p1 = scmp.ne.s32.totalorder %s1536_s3, %s1086_s7  ;;  %p1093_p10 = scmp.lt.u32.totalorder %s1086_s7, %s1536_s3 }
  0x2b   : > { %p1089_p2 = pnand %p1087_p1, %p1060_p13 }
  0x2d   : > { %p1090_p6 = pneg %p1089_p2 }
  0x2f   : > { %p1095_p3 = pnand %p1093_p10, %p1090_p6 }
  0x31   : > { %1098 = shalt.err (!%p1095_p3)
}
  0x32   : > { %s1099_s28 = scalar_lea.vmem %s1309_s6, 1024  ;;  %p1107_p12 = scmp.lt.s32.totalorder %s1309_s6, %s1309_s6 }
  0x33   : > { %p1100_p5 = scmp.ne.s32.totalorder %s1309_s6, %s1099_s28  ;;  %p1108_p0 = scmp.lt.s32.totalorder %s1099_s28, %s1099_s28 }
  0x35   : > { %p1102_p7 = pnand %p1100_p5, %p1060_p13  ;;  %p1109_p1 = por %p1108_p0, %p1107_p12 }
  0x37   : > { %p1103_p9 = pneg %p1102_p7 }
  0x39   : > { %p1110_p2 = pnand %p1109_p1, %p1103_p9 }
  0x3b   : > { %1113 = shalt.err (!%p1110_p2)
}
  0x3c   : > { %981 = dma.hbm_to_vmem [thread:$0]  (!%p1305_p11), %s1536_s3, 1024, %s1309_s6, [#allocation6], %s1218_s15, %s1218_s15, %s1219_s16  }
  0x3d   : > { %s1370_s29 = sadd.s32 1, %s1214_s21   ;;  %s29_s14 = sadd.s32 1, %s1210_s20 }
  0x3e   : > { %s26_s17 = ssub.s32 %s1214_s21, %s1370_s29  ;;  %p36_p13 = scmp.ne.s32.totalorder %s1210_s20, %s1206_s19 }
  0x3f   : > { %p27_p6 = scmp.eq.s32.totalorder %s26_s17, 0  ;;  %p37_p10 = scmp.eq.s32.totalorder %s1214_s21, 0 }
  0x40   : > { %p1546_p3 = scmp.eq.s32.totalorder %s1275_s22, 1  ;;  %p992_p7 = scmp.lt.s32.totalorder %s1214_s21, 2 }
  0x41   : > { %s1386_s27 = scalar_select %p27_p6, %s1210_s20, %s29_s14  }
  0x42   : > { %p1380_p5 = por %p1546_p3, %p36_p13  ;;  %p38_p9 = por %p37_p10, %p36_p13 }
  0x43   : > { %s208_s30 = sand.u32 1, %s1210_s20   ;;  %s865_s6 = sshll.u32 %s1214_s21, 10 }
  0x44   : > { %s1547_s23 = scalar_select %p1380_p5, 1, 0 }
  0x45   : > { %s826_s7 = sshll.u32 %s208_s30, 6  ;;  %s1393_s10 = scalar_lea.hbm %s1533_s0, %s865_s6 }
  0x46   : > { %s212_s11 = scalar_lea.vmem [#allocation2], %s826_s7  ;;  %p1397_p11 = pnand %p992_p7, %p38_p9 }
  0x47   : > { %s219_s28 = sshll.u32 %s212_s11, 4  ;;  %s1401_s13 = scalar_lea.sflag [#allocation3], %s208_s30  ;;  %s1395_s28 = int_to_ptr.vmem [resolvable:$true] %s219_s28 }
  0x48   : > { %s1114_s14 = scalar_lea.hbm %s1393_s10, 1024  ;;  %p1116_p0 = pneg %p1397_p11 }
  0x49   : > { %p1115_p12 = scmp.ne.s32.totalorder %s1393_s10, %s1114_s14  ;;  %s1119_s6 = scalar_lea.hbm %s1533_s0, 2048 }
  0x4a   : > { %p1120_p13 = scmp.lt.u32.totalorder %s1393_s10, %s1533_s0  ;;  %p1121_p6 = scmp.lt.u32.totalorder %s1119_s6, %s1114_s14 }
  0x4b   : > { %p1117_p1 = pnand %p1116_p0, %p1115_p12  ;;  %p1123_p3 = scmp.lt.u32.totalorder %s1114_s14, %s1393_s10 }
  0x4c   : > { %p1122_p10 = por %p1121_p6, %p1120_p13 }
  0x4d   : > { %p1118_p2 = pneg %p1117_p1 }
  0x4e   : > { %p1124_p7 = por %p1123_p3, %p1122_p10 }
  0x50   : > { %p1125_p9 = pnand %p1124_p7, %p1118_p2 }
  0x52   : > { %1128 = shalt.err (!%p1125_p9)
}
  0x53   : > { %s1129_s30 = scalar_lea.vmem %s1395_s28, 1024  ;;  %s1220_s11 = smov [#allocation2]  }
  0x54   : > { %p1130_p12 = scmp.ne.s32.totalorder %s1395_s28, %s1129_s30  ;;  %s1134_s17 = sshll.u32 %s1220_s11, 4  ;;  %s1135_s17 = int_to_ptr.vmem [resolvable:$false] %s1134_s17 }
  0x55   : > { %s1136_s7 = scalar_lea.vmem %s1135_s17, 2048  ;;  %p1137_p4 = scmp.lt.s32.totalorder %s1395_s28, %s1135_s17 }
  0x56   : > { %p1132_p1 = pnand %p1130_p12, %p1116_p0  ;;  %p1138_p13 = scmp.lt.s32.totalorder %s1136_s7, %s1129_s30 }
  0x58   : > { %p1133_p5 = pneg %p1132_p1  ;;  %p1139_p6 = por %p1138_p13, %p1137_p4 }
  0x5a   : > { %p1140_p10 = pnand %p1139_p6, %p1133_p5 }
  0x5c   : > { %1143 = shalt.err (!%p1140_p10)
}
  0x5d   : > { %985 = dma.hbm_to_vmem [thread:$0]  (!%p1397_p11), %s1393_s10, 1024, %s1395_s28, %s1401_s13, %s1218_s15, %s1218_s15, %s1219_s16  }
  0x5e   : > { %231 = sbr.rel (%p1294_p8) target bundleno = 616 (0x268), region = 40  ;;  %s1435_s14 = sand.u32 (!%p1294_p8), 1, %s1206_s19  }
  0x5f   : > { %s830_s6 = sshll.u32 (!%p1294_p8), %s1435_s14, 6  ;;  %s234_s8 = scalar_lea.sflag (!%p1294_p8), [#allocation3], %s1435_s14 }
  0x60   : > { %s1439_s9 = scalar_lea.vmem (!%p1294_p8), [#allocation2], %s830_s6  ;;  %p1549_p4 = scmp.ne.s32.totalorder (!%p1294_p8), %s1542_s24, 0 }
  0x65   : > { %1189 = dma.done.wait (%p1549_p4), %s234_s8, 1024  }
  0x66   : > { %1191 = vsyncadd (%p1549_p4), %s234_s8, 4294966272  ;;  %p1550_p5 = scmp.eq.s32.totalorder %s1275_s22, 0 }
  0x68   : > { %1193 = dma.done.wait (%p1550_p5), [#allocation6], 2048   ;;  %p1551_p8 = pmov %p1550_p5 }
  0x69   : > { %v1034_v0 = vld [vmem:[#allocation5] sm:$0xff]   ;;  %v1035_v1 = vld [vmem:[#allocation5 + $0x8] sm:$0xff]   ;;  %v1036_v2 = vld [vmem:[#allocation5 + $0x10] sm:$0xff]   ;;  %s833_s15 = sshll.u32 %s1435_s14, 7  ;;  %s866_s12 = sshll.u32 %s1275_s22, 11 }
  0x6a   : > { %1195 = vsyncadd (%p1551_p8), [#allocation6], 4294965248  ;;  %899 = vmatprep.subr.bf16.mxu0 %v1034_v0  ;;  %v1037_v3 = vld [vmem:[#allocation5 + $0x18] sm:$0xff]   ;;  %v1042_v4 = vld [vmem:[%s1439_s9] sm:$0xff]   ;;  %s1464_s28 = scalar_lea.vmem [#allocation8], %s833_s15  ;;  %s1484_s17 = scalar_lea.hbm %s1538_s5, %s866_s12 }
  0x6b   : > { %900 = vmatpush3.bf16.msra.mxu0 %v1034_v0  ;;  %915 = vmatprep.mubr.bf16.mxu0 %v1042_v4  ;;  %v1038_v5 = vld [vmem:[#allocation5 + $0x20] sm:$0xff]   ;;  %v1039_v6 = vld [vmem:[#allocation5 + $0x28] sm:$0xff]   ;;  %v1040_v9 = vld [vmem:[#allocation5 + $0x30] sm:$0xff]   ;;  %s729_s13 = sshll.u32 %s1464_s28, 4  ;;  %s716_s22 = scalar_lea.sflag [#allocation4], %s1435_s14  ;;  %s1486_s13 = int_to_ptr.vmem [resolvable:$true] %s729_s13 }
  0x6c   : > { %901 = vmatprep.subr.bf16.mxu0 %v1035_v1  ;;  %v1050_v7 = vld [vmem:[#allocation7] sm:$0xff]   ;;  %v1051_v8 = vld [vmem:[#allocation7 + $0x8] sm:$0xff]   ;;  %v1052_v10 = vld [vmem:[#allocation7 + $0x10] sm:$0xff]   ;;  %s1144_s7 = scalar_lea.vmem %s1486_s13, 2048  ;;  %p1552_p0 = scmp.ne.s32.totalorder %s1547_s23, 0 }
  0x6d   : > { %931 = vmatprep.subr.bf16.mxu1 %v1050_v7  ;;  %v1041_v11 = vld [vmem:[#allocation5 + $0x38] sm:$0xff]   ;;  %v1054_v13 = vld [vmem:[#allocation7 + $0x20] sm:$0xff]   ;;  %v1043_v14 = vld [vmem:[%s1439_s9 + $0x8] sm:$0xff]   ;;  %p1145_p11 = scmp.ne.s32.totalorder %s1486_s13, %s1144_s7  ;;  %s1221_s6 = smov [#allocation8]  }
  0x6e   : > { %932 = vmatpush3.bf16.msra.mxu1 %v1050_v7  ;;  %v1053_v12 = vld [vmem:[#allocation7 + $0x18] sm:$0xff]   ;;  %v1044_v15 = vld [vmem:[%s1439_s9 + $0x10] sm:$0xff]   ;;  %v1055_v16 = vld [vmem:[#allocation7 + $0x28] sm:$0xff]   ;;  %s1148_s8 = sshll.u32 %s1221_s6, 4  ;;  %s1149_s8 = int_to_ptr.vmem [resolvable:$false] %s1148_s8 }
  0x6f   : > { %902 = vmatpush3.bf16.msra.mxu0 %v1035_v1  ;;  %933 = vmatprep.subr.bf16.mxu1 %v1051_v8  ;;  %v1045_v17 = vld [vmem:[%s1439_s9 + $0x18] sm:$0xff]   ;;  %v1046_v18 = vld [vmem:[%s1439_s9 + $0x20] sm:$0xff]   ;;  %v1047_v19 = vld [vmem:[%s1439_s9 + $0x28] sm:$0xff]   ;;  %p1146_p2 = pnand %p1145_p11, %p1552_p0  ;;  %p1151_p7 = scmp.lt.s32.totalorder %s1486_s13, %s1149_s8 }
  0x70   : > { %903 = vmatprep.subr.bf16.mxu0 %v1036_v2  ;;  %v1048_v20 = vld [vmem:[%s1439_s9 + $0x30] sm:$0xff]   ;;  %v1049_v21 = vld [vmem:[%s1439_s9 + $0x38] sm:$0xff]   ;;  %v834_v24 = vld [vmem:[%s1535_s2] ss:$0 sm:$0xff]  ;;  %s1150_s9 = scalar_lea.vmem %s1149_s8, 4096 }
  0x71   : > { %v1056_v22 = vld [vmem:[#allocation7 + $0x30] sm:$0xff]   ;;  %v1057_v23 = vld [vmem:[#allocation7 + $0x38] sm:$0xff]   ;;  %p1147_p3 = pneg %p1146_p2  ;;  %p1152_p9 = scmp.lt.s32.totalorder %s1150_s9, %s1144_s7 }
  0x72   : > { %934 = vmatpush3.bf16.msra.mxu1 %v1051_v8 }
  0x73   : > { %904 = vmatpush3.bf16.msra.mxu0 %v1036_v2  ;;  %935 = vmatprep.subr.bf16.mxu1 %v1052_v10  ;;  %p1153_p12 = por %p1152_p9, %p1151_p7 }
  0x74   : > { %905 = vmatprep.subr.bf16.mxu0 %v1037_v3 }
  0x75   : > { %p1154_p1 = pnand %p1153_p12, %p1147_p3 }
  0x76   : > { %936 = vmatpush3.bf16.msra.mxu1 %v1052_v10 }
  0x77   : > { %906 = vmatpush3.bf16.msra.mxu0 %v1037_v3  ;;  %937 = vmatprep.subr.bf16.mxu1 %v1053_v12 }
  0x78   : > { %907 = vmatprep.subr.bf16.mxu0 %v1038_v5 }
  0x7a   : > { %938 = vmatpush3.bf16.msra.mxu1 %v1053_v12 }
  0x7b   : > { %908 = vmatpush3.bf16.msra.mxu0 %v1038_v5  ;;  %939 = vmatprep.subr.bf16.mxu1 %v1054_v13 }
  0x7c   : > { %909 = vmatprep.subr.bf16.mxu0 %v1039_v6 }
  0x7e   : > { %940 = vmatpush3.bf16.msra.mxu1 %v1054_v13 }
  0x7f   : > { %910 = vmatpush3.bf16.msra.mxu0 %v1039_v6  ;;  %941 = vmatprep.subr.bf16.mxu1 %v1055_v16 }
  0x80   : > { %911 = vmatprep.subr.bf16.mxu0 %v1040_v9 }
  0x82   : > { %942 = vmatpush3.bf16.msra.mxu1 %v1055_v16 }
  0x83   : > { %912 = vmatpush3.bf16.msra.mxu0 %v1040_v9  ;;  %943 = vmatprep.subr.bf16.mxu1 %v1056_v22 }
  0x84   : > { %913 = vmatprep.subr.bf16.mxu0 %v1041_v11 }
  0x86   : > { %944 = vmatpush3.bf16.msra.mxu1 %v1056_v22 }
  0x87   : > { %914 = vmatpush3.bf16.msra.mxu0 %v1041_v11  ;;  %945 = vmatprep.subr.bf16.mxu1 %v1057_v23 }
  0x8a   : > { %916 = vmatmul.mubr.bf16.vlgmr.msra.gmra.mrb[0].mxu0 %v1043_v14  ;;  %946 = vmatpush3.bf16.msra.mxu1 %v1057_v23 }
  0x8b   : > { %919 = vmatprep.mubr.bf16.mxu0 %v1044_v15 }
  0x92   : > { %920 = vmatmul.mubr.bf16.gmra.mrb[4].mxu0 %v1045_v17  ;;  %v851_v17 = vld [vmem:[%s1537_s4] ss:$0 sm:$0xff] }
  0x93   : > { %923 = vmatprep.mubr.bf16.mxu0 %v1046_v18 }
  0x9a   : > { %924 = vmatmul.mubr.bf16.gmra.mrb[8].mxu0 %v1047_v19 }
  0x9b   : > { %927 = vmatprep.mubr.bf16.mxu0 %v1048_v20 }
  0xa2   : > { %928 = vmatmul.mubr.bf16.gmra.mrb[12].mxu0 %v1049_v21 }
 0x15d   : > { %v917_v25 = vpop.f32.mrb[0].mxu0 }
 0x15e   : > { %v453_v26 = vadd.f32 %v917_v25, %v834_v24  ;;  %v444_v27 = vpop.f32.mrb[1].mxu0 }
 0x15f   : > { %v445_v28 = vadd.f32 %v834_v24, %v444_v27  ;;  %v918_v29 = vpop.f32.mrb[2].mxu0 }
 0x160   : > { %v456_v30 = vadd.f32 %v918_v29, %v834_v24  ;;  %v447_v31 = vpop.f32.mrb[3].mxu0  ;;  %v509_v33 = vmax.f32 %v453_v26, 0.0 }
 0x161   : > { %v448_v32 = vadd.f32 %v834_v24, %v447_v31  ;;  %v507_v35 = vmax.f32 %v445_v28, 0.0 }
 0x162   : > { %v510_v34 = vmax.f32 %v456_v30, 0.0 }
 0x163   : > { %v508_v36 = vmax.f32 %v448_v32, 0.0 }
 0x164   : > { %v524_v37 = vpack.c.bf16 %v510_v34, %v509_v33 }
 0x165   : > { %v921_v38 = vpop.f32.mrb[4].mxu0  ;;  %v523_v39 = vpack.c.bf16 %v508_v36, %v507_v35 }
 0x166   : > { %v469_v40 = vadd.f32 %v921_v38, %v834_v24  ;;  %v460_v41 = vpop.f32.mrb[5].mxu0 }
 0x167   : > { %v461_v42 = vadd.f32 %v834_v24, %v460_v41  ;;  %v922_v43 = vpop.f32.mrb[6].mxu0  ;;  %947 = vmatprep.mubr.bf16.mxu1 %v523_v39 }
 0x168   : > { %v472_v44 = vadd.f32 %v922_v43, %v834_v24  ;;  %v463_v45 = vpop.f32.mrb[7].mxu0  ;;  %948 = vmatmul.mubr.bf16.vlgmr.msra.gmra.mrb[0].mxu1 %v524_v37  ;;  %v513_v47 = vmax.f32 %v469_v40, 0.0 }
 0x169   : > { %v464_v46 = vadd.f32 %v834_v24, %v463_v45  ;;  %v511_v49 = vmax.f32 %v461_v42, 0.0 }
 0x16a   : > { %v514_v48 = vmax.f32 %v472_v44, 0.0 }
 0x16b   : > { %v512_v50 = vmax.f32 %v464_v46, 0.0 }
 0x16c   : > { %v526_v51 = vpack.c.bf16 %v514_v48, %v513_v47 }
 0x16d   : > { %v525_v52 = vpack.c.bf16 %v512_v50, %v511_v49  ;;  %v925_v53 = vpop.f32.mrb[8].mxu0 }
 0x16e   : > { %v485_v54 = vadd.f32 %v925_v53, %v834_v24  ;;  %v476_v55 = vpop.f32.mrb[9].mxu0 }
 0x16f   : > { %v477_v56 = vadd.f32 %v834_v24, %v476_v55  ;;  %v926_v57 = vpop.f32.mrb[10].mxu0  ;;  %951 = vmatprep.mubr.bf16.mxu1 %v525_v52 }
 0x170   : > { %v488_v58 = vadd.f32 %v926_v57, %v834_v24  ;;  %v479_v59 = vpop.f32.mrb[11].mxu0  ;;  %952 = vmatmul.mubr.bf16.gmra.mrb[4].mxu1 %v526_v51  ;;  %v517_v61 = vmax.f32 %v485_v54, 0.0 }
 0x171   : > { %v480_v60 = vadd.f32 %v834_v24, %v479_v59  ;;  %v515_v63 = vmax.f32 %v477_v56, 0.0 }
 0x172   : > { %v518_v62 = vmax.f32 %v488_v58, 0.0 }
 0x173   : > { %v516_v0 = vmax.f32 %v480_v60, 0.0 }
 0x174   : > { %v528_v1 = vpack.c.bf16 %v518_v62, %v517_v61 }
 0x175   : > { %v527_v2 = vpack.c.bf16 %v516_v0, %v515_v63  ;;  %v929_v3 = vpop.f32.mrb[12].mxu0 }
 0x176   : > { %v501_v4 = vadd.f32 %v929_v3, %v834_v24  ;;  %v492_v5 = vpop.f32.mrb[13].mxu0 }
 0x177   : > { %v493_v6 = vadd.f32 %v834_v24, %v492_v5  ;;  %v930_v7 = vpop.f32.mrb[14].mxu0  ;;  %955 = vmatprep.mubr.bf16.mxu1 %v527_v2 }
 0x178   : > { %v504_v8 = vadd.f32 %v930_v7, %v834_v24  ;;  %v495_v9 = vpop.f32.mrb[15].mxu0  ;;  %956 = vmatmul.mubr.bf16.gmra.mrb[8].mxu1 %v528_v1  ;;  %v521_v11 = vmax.f32 %v501_v4, 0.0 }
 0x179   : > { %v496_v10 = vadd.f32 %v834_v24, %v495_v9  ;;  %v519_v13 = vmax.f32 %v493_v6, 0.0 }
 0x17a   : > { %v522_v12 = vmax.f32 %v504_v8, 0.0 }
 0x17b   : > { %v520_v14 = vmax.f32 %v496_v10, 0.0 }
 0x17c   : > { %v530_v15 = vpack.c.bf16 %v522_v12, %v521_v11 }
 0x17d   : > { %v529_v16 = vpack.c.bf16 %v520_v14, %v519_v13 }
 0x17f   : > { %959 = vmatprep.mubr.bf16.mxu1 %v529_v16 }
 0x180   : > { %960 = vmatmul.mubr.bf16.gmra.mrb[12].mxu1 %v530_v15 }
 0x23b   : > { %v949_v18 = vpop.f32.mrb[0].mxu1 }
 0x23c   : > { %v645_v19 = vadd.f32 %v949_v18, %v851_v17  ;;  %v636_v20 = vpop.f32.mrb[1].mxu1 }
 0x23d   : > { %v637_v21 = vadd.f32 %v851_v17, %v636_v20  ;;  %v950_v22 = vpop.f32.mrb[2].mxu1 }
 0x23e   : > { %701 = vst [vmem:[%s1464_s28 + $0x10] sm:$0xff] %v645_v19  ;;  %v648_v23 = vadd.f32 %v950_v22, %v851_v17  ;;  %v639_v24 = vpop.f32.mrb[3].mxu1 }
 0x23f   : > { %699 = vst [vmem:[%s1464_s28] sm:$0xff] %v637_v21  ;;  %v640_v25 = vadd.f32 %v851_v17, %v639_v24 }
 0x240   : > { %702 = vst [vmem:[%s1464_s28 + $0x18] sm:$0xff] %v648_v23 }
 0x241   : > { %700 = vst [vmem:[%s1464_s28 + $0x8] sm:$0xff] %v640_v25 }
 0x243   : > { %v953_v26 = vpop.f32.mrb[4].mxu1 }
 0x244   : > { %v661_v27 = vadd.f32 %v953_v26, %v851_v17  ;;  %v652_v28 = vpop.f32.mrb[5].mxu1 }
 0x245   : > { %v653_v29 = vadd.f32 %v851_v17, %v652_v28  ;;  %v954_v30 = vpop.f32.mrb[6].mxu1 }
 0x246   : > { %705 = vst [vmem:[%s1464_s28 + $0x30] sm:$0xff] %v661_v27  ;;  %v664_v31 = vadd.f32 %v954_v30, %v851_v17  ;;  %v655_v32 = vpop.f32.mrb[7].mxu1 }
 0x247   : > { %703 = vst [vmem:[%s1464_s28 + $0x20] sm:$0xff] %v653_v29  ;;  %v656_v33 = vadd.f32 %v851_v17, %v655_v32 }
 0x248   : > { %706 = vst [vmem:[%s1464_s28 + $0x38] sm:$0xff] %v664_v31 }
 0x249   : > { %704 = vst [vmem:[%s1464_s28 + $0x28] sm:$0xff] %v656_v33 }
 0x24b   : > { %v957_v34 = vpop.f32.mrb[8].mxu1 }
 0x24c   : > { %v677_v35 = vadd.f32 %v957_v34, %v851_v17  ;;  %v668_v36 = vpop.f32.mrb[9].mxu1 }
 0x24d   : > { %v669_v37 = vadd.f32 %v851_v17, %v668_v36  ;;  %v958_v38 = vpop.f32.mrb[10].mxu1 }
 0x24e   : > { %709 = vst [vmem:[%s1464_s28 + $0x50] sm:$0xff] %v677_v35  ;;  %v680_v39 = vadd.f32 %v958_v38, %v851_v17  ;;  %v671_v40 = vpop.f32.mrb[11].mxu1 }
 0x24f   : > { %707 = vst [vmem:[%s1464_s28 + $0x40] sm:$0xff] %v669_v37  ;;  %v672_v41 = vadd.f32 %v851_v17, %v671_v40 }
 0x250   : > { %710 = vst [vmem:[%s1464_s28 + $0x58] sm:$0xff] %v680_v39 }
 0x251   : > { %708 = vst [vmem:[%s1464_s28 + $0x48] sm:$0xff] %v672_v41 }
 0x253   : > { %v961_v42 = vpop.f32.mrb[12].mxu1 }
 0x254   : > { %v693_v43 = vadd.f32 %v961_v42, %v851_v17  ;;  %v684_v44 = vpop.f32.mrb[13].mxu1 }
 0x255   : > { %v685_v45 = vadd.f32 %v851_v17, %v684_v44  ;;  %v962_v46 = vpop.f32.mrb[14].mxu1 }
 0x256   : > { %713 = vst [vmem:[%s1464_s28 + $0x70] sm:$0xff] %v693_v43  ;;  %v696_v47 = vadd.f32 %v962_v46, %v851_v17  ;;  %v687_v48 = vpop.f32.mrb[15].mxu1 }
 0x257   : > { %711 = vst [vmem:[%s1464_s28 + $0x60] sm:$0xff] %v685_v45  ;;  %v688_v49 = vadd.f32 %v851_v17, %v687_v48 }
 0x258   : > { %714 = vst [vmem:[%s1464_s28 + $0x78] sm:$0xff] %v696_v47 }
 0x259   : > { %712 = vst [vmem:[%s1464_s28 + $0x68] sm:$0xff] %v688_v49 }
 0x25a   : > { %1157 = shalt.err (!%p1154_p1)
}
 0x25b   : > { %s1158_s24 = scalar_lea.hbm %s1484_s17, 2048  ;;  %s1162_s16 = scalar_lea.hbm %s1538_s5, 4096 }
 0x25c   : > { %p1159_p13 = scmp.ne.s32.totalorder %s1484_s17, %s1158_s24  ;;  %p1163_p4 = scmp.lt.u32.totalorder %s1484_s17, %s1538_s5 }
 0x25d   : > { %p1164_p5 = scmp.lt.u32.totalorder %s1162_s16, %s1158_s24  ;;  %p1166_p11 = scmp.lt.u32.totalorder %s1158_s24, %s1484_s17 }
 0x25e   : > { %p1160_p6 = pnand %p1159_p13, %p1552_p0 }
 0x25f   : > { %p1165_p8 = por %p1164_p5, %p1163_p4 }
 0x260   : > { %p1161_p10 = pneg %p1160_p6 }
 0x261   : > { %p1167_p2 = por %p1166_p11, %p1165_p8 }
 0x263   : > { %p1168_p3 = pnand %p1167_p2, %p1161_p10 }
 0x265   : > { %1171 = shalt.err (!%p1168_p3)
}
 0x266   : > { %s1222_s12 = smov 128   ;;  %s1223_s30 = smov 8  }
 0x267   : > { %973 = dma.vmem_to_hbm [thread:$0]  (%p1552_p0), %s1486_s13, 2048, %s1484_s17, %s716_s22, %s1222_s12, %s1222_s12, %s1223_s30  }
 0x268 PF: > { %s744_s11 = sand.u32 1, %s1202_s18   ;;  %p1553_p7 = scmp.ne.s32.totalorder %s1543_s25, 0 }
 0x269   : > { %p1554_p9 = scmp.ge.s32.totalorder %s1214_s21, 2  ;;  %s745_s7 = scalar_lea.sflag [#allocation4], %s744_s11 }
 0x26b   : > { %p987_p12 = pnand %p1554_p9, %p1553_p7 }
 0x26d   : > { %1197 = dma.done.wait (!%p987_p12), %s745_s7, 2048  }
 0x26e   : > { %1199 = vsyncadd (!%p987_p12), %s745_s7, 4294965248  ;;  %p19_p1 = scmp.ge.s32.totalorder %s1370_s29, 4   ;;  %s1555_s18 = smov %s1206_s19 }
 0x26f   : > { %s1556_s19 = smov %s1210_s20  ;;  %s1557_s20 = smov %s1386_s27 }
 0x270   : > { %s1558_s21 = smov %s1370_s29  ;;  %21 = sbr.rel (!%p19_p1) target bundleno = 6 (0x6), region = 93 }
 0x277   :  { %750 = vsyncpa [#allocation3], 1 }
 0x278   :  { %752 = vsyncpa [#allocation3 + $0x1], 1 }
 0x279   :  { %753 = vsyncpa [#allocation6], 1 }
 0x27a   :  { %754 = vsyncpa [#allocation4], 1 }
 0x27b   :  { %756 = vsyncpa [#allocation4 + $0x1], 1 }

</bundles_post_ra>
